<compile_context>
chip_gen: v7x
topology: tpu7x:2x2x1
jax: 0.10.0
libtpu: 0.0.40
codegen_flags: <defaults>
</compile_context>

<pallas_src>
import functools
import math

import jax
import jax.numpy as jnp
from jax import lax
from jax.experimental import pallas as pl
from jax.experimental.pallas import tpu as pltpu


# ------------------------------ tiling helper ------------------------------
def _pick_tile(dim, target, align):
    """Largest tile <= target that divides dim and is a multiple of align,
    else the full dim (full-dim blocks are always legal)."""
    if dim <= target:
        return dim
    t = (target // align) * align
    while t >= align:
        if dim % t == 0:
            return t
        t -= align
    return dim


# --------------------------- tiled Linear (no bias) ---------------------------
def _matmul_kernel(x_ref, w_ref, o_ref, acc_ref):
    @pl.when(pl.program_id(2) == 0)
    def _init():
        acc_ref[...] = jnp.zeros_like(acc_ref)

    acc_ref[...] += jnp.dot(
        x_ref[...], w_ref[...], preferred_element_type=jnp.float32
    )

    @pl.when(pl.program_id(2) == pl.num_programs(2) - 1)
    def _finalize():
        o_ref[...] = acc_ref[...].astype(o_ref.dtype)


def linear_pallas(x2d, w_kn, *, tm=256, tn=256, tk=512):
    """y = x2d @ w_kn, with w_kn already in (in, out) layout (no per-call w.T)."""
    M, K = x2d.shape
    N = w_kn.shape[1]
    tm = _pick_tile(M, tm, 8)
    tn = _pick_tile(N, tn, 128)
    tk = _pick_tile(K, tk, 128)
    grid = (M // tm, N // tn, K // tk)
    return pl.pallas_call(
        _matmul_kernel,
        out_shape=jax.ShapeDtypeStruct((M, N), jnp.float32),
        grid=grid,
        in_specs=[
            pl.BlockSpec((tm, tk), lambda i, j, k: (i, k)),
            pl.BlockSpec((tk, tn), lambda i, j, k: (k, j)),
        ],
        out_specs=pl.BlockSpec((tm, tn), lambda i, j, k: (i, j)),
        scratch_shapes=[pltpu.VMEM((tm, tn), jnp.float32)],
        compiler_params=pltpu.CompilerParams(
            dimension_semantics=("parallel", "parallel", "arbitrary")
        ),
    )(x2d, w_kn)


# --------------------------- flash-style attention ---------------------------
def _attn_kernel(q_ref, k_ref, v_ref, msk_ref, o_ref, m_s, l_s, acc_s,
                 *, H, d_atn, d_v):
    ki = pl.program_id(2)

    @pl.when(ki == 0)
    def _init():
        m_s[...] = jnp.full_like(m_s, -jnp.inf)
        l_s[...] = jnp.zeros_like(l_s)
        acc_s[...] = jnp.zeros_like(acc_s)

    q = q_ref[0]                                   # (tq, H*d_atn), scale pre-folded
    k = k_ref[0]                                   # (tk, H*d_atn)
    v = v_ref[0]                                   # (tk, H*d_v)
    # mask compare hoisted out of the head loop; int8 -> int32 unpack is cheap
    masked = msk_ref[0].astype(jnp.int32) == 0     # (tq, tk) bool

    for h in range(H):                             # static unroll over heads
        qh = q[:, h * d_atn:(h + 1) * d_atn]
        kh = k[:, h * d_atn:(h + 1) * d_atn]
        vh = v[:, h * d_v:(h + 1) * d_v]
        # MXU consumes the transposed contraction directly (no kh.T materialized)
        s = lax.dot_general(qh, kh, (((1,), (1,)), ((), ())),
                            preferred_element_type=jnp.float32)   # (tq, tk)
        # exact torch masked_fill_(-1e10) semantics
        s = jnp.where(masked, jnp.float32(-1e10), s)

        m_prev = m_s[h]                                            # (tq, 1)
        m_new = jnp.maximum(m_prev, jnp.max(s, axis=-1, keepdims=True))
        corr = jnp.exp(m_prev - m_new)
        p = jnp.exp(s - m_new)                                     # unnormalized
        l_s[h] = corr * l_s[h] + jnp.sum(p, axis=-1, keepdims=True)
        acc_s[h] = corr * acc_s[h] + jnp.dot(
            p.astype(vh.dtype), vh, preferred_element_type=jnp.float32)
        m_s[h] = m_new

    @pl.when(ki == pl.num_programs(2) - 1)
    def _finalize():
        # deferred normalization: one reciprocal per row per head, then a single
        # lane-dense (tq, H*d_v) store instead of H narrow masked stores.
        chunks = []
        for h in range(H):
            inv = pl.reciprocal(l_s[h], approx=False)
            chunks.append(acc_s[h] * inv)
        o_ref[0] = jnp.concatenate(chunks, axis=-1).astype(o_ref.dtype)


def mha_attention_core(qp, kp, vp, mask_i8, *, num_heads, d_atn, d_v):
    """qp: (B,Nq,H*d_atn), kp: (B,Nk,H*d_atn), vp: (B,Nk,H*d_v) — head-contiguous.
    mask_i8: (B,Nq,Nk) int8. Returns head-contiguous (B, Nq, H*d_v) f32."""
    B, Nq, Dq = qp.shape
    Nk = kp.shape[1]
    Dv = vp.shape[2]
    tq = _pick_tile(Nq, 128, 8)
    tk = _pick_tile(Nk, 256, 128)
    kernel = functools.partial(_attn_kernel, H=num_heads, d_atn=d_atn, d_v=d_v)
    return pl.pallas_call(
        kernel,
        out_shape=jax.ShapeDtypeStruct((B, Nq, Dv), jnp.float32),
        grid=(B, Nq // tq, Nk // tk),
        in_specs=[
            pl.BlockSpec((1, tq, Dq), lambda b, qi, ki: (b, qi, 0)),
            pl.BlockSpec((1, tk, Dq), lambda b, qi, ki: (b, ki, 0)),
            pl.BlockSpec((1, tk, Dv), lambda b, qi, ki: (b, ki, 0)),
            pl.BlockSpec((1, tq, tk), lambda b, qi, ki: (b, qi, ki)),
        ],
        out_specs=pl.BlockSpec((1, tq, Dv), lambda b, qi, ki: (b, qi, 0)),
        scratch_shapes=[
            pltpu.VMEM((num_heads, tq, 1), jnp.float32),    # running max m
            pltpu.VMEM((num_heads, tq, 1), jnp.float32),    # running sum l
            pltpu.VMEM((num_heads, tq, d_v), jnp.float32),  # output accumulator
        ],
        compiler_params=pltpu.CompilerParams(
            dimension_semantics=("parallel", "parallel", "arbitrary")
        ),
    )(qp, kp, vp, mask_i8)


# ------------------------------- Module wrapper -------------------------------
def _head_contig_perm(d_dim, num_heads):
    """Map head-contiguous index c' = h*d_dim + d  ->  torch index c = d*H + h."""
    idx = jnp.arange(num_heads * d_dim)
    h = idx // d_dim
    d = idx % d_dim
    return d * num_heads + h


class MultiHeadAttentionPallas:
    def __init__(self, num_heads, d_q_in, d_k_in, d_v_in, d_atn, d_v, d_out, key):
        self.num_heads = num_heads
        self.d_atn = d_atn
        self.d_v = d_v
        k0, k1, k2, k3 = jax.random.split(key, 4)
        # Source-of-truth weights in torch Linear layout (out_features, in_features).
        self.wq = 0.1 * jax.random.normal(k0, (d_atn * num_heads, d_q_in), jnp.float32)
        self.wk = 0.1 * jax.random.normal(k1, (d_atn * num_heads, d_k_in), jnp.float32)
        self.wv = 0.1 * jax.random.normal(k2, (d_v * num_heads, d_v_in), jnp.float32)
        self.wo = 0.1 * jax.random.normal(k3, (d_out, num_heads * d_v), jnp.float32)

        # Init-time replumbing (zero runtime cost):
        #  - head-permute so projection outputs are head-contiguous (kills the 4
        #    XLA transposes around the attention kernel),
        #  - transpose to (in, out) so kernels never see w.T,
        #  - fold 1/sqrt(d_atn) into the query weights (no score divide in-kernel).
        perm_atn = _head_contig_perm(d_atn, num_heads)
        perm_v = _head_contig_perm(d_v, num_heads)
        inv_scale = 1.0 / math.sqrt(float(d_atn))
        self.wq_t = (self.wq[perm_atn, :] * inv_scale).T      # (d_q_in, H*d_atn)
        self.wk_t = self.wk[perm_atn, :].T                    # (d_k_in, H*d_atn)
        self.wv_t = self.wv[perm_v, :].T                      # (d_v_in, H*d_v)
        self.wo_t = self.wo[:, perm_v].T                      # (H*d_v, d_out)
        # TODO(synk): Dropout(0.1) is a no-op in eval / deterministic forward; not implemented.

    def __call__(self, queries, keys, values, mask=None):
        B, Nq, _ = queries.shape
        Nk = keys.shape[1]
        # projections -> head-contiguous (B, N, H*d); reshapes are free (contiguous)
        qp = linear_pallas(queries.reshape(B * Nq, -1), self.wq_t).reshape(B, Nq, -1)
        kp = linear_pallas(keys.reshape(B * Nk, -1), self.wk_t).reshape(B, Nk, -1)
        vp = linear_pallas(values.reshape(B * Nk, -1), self.wv_t).reshape(B, Nk, -1)
        if mask is None:
            mask_i8 = jnp.ones((B, Nq, Nk), dtype=jnp.int8)
        else:
            mask_i8 = mask.astype(jnp.int8)
        attn = mha_attention_core(qp, kp, vp, mask_i8, num_heads=self.num_heads,
                                  d_atn=self.d_atn, d_v=self.d_v)  # (B, Nq, H*d_v)
        out = linear_pallas(attn.reshape(B * Nq, -1), self.wo_t).reshape(B, Nq, -1)
        return out


# ------------------------------ Pure-JAX reference ----------------------------
def reference_forward(mod, queries, keys, values, mask):
    """Exact replica of the torch module semantics, using the torch-layout weights."""
    B, Nq, _ = queries.shape
    Nk = keys.shape[1]
    H = mod.num_heads
    qs = (queries @ mod.wq.T).reshape(B, Nq, -1, H)
    ks = (keys @ mod.wk.T).reshape(B, Nk, -1, H)
    vs = (values @ mod.wv.T).reshape(B, Nk, -1, H)
    dk = ks.shape[-2]
    w = jnp.einsum("bidh,bodh->bioh", qs, ks) / jnp.sqrt(jnp.float32(dk))
    m = jnp.repeat(mask[..., None], H, axis=-1)
    w = jnp.where(m == 0, jnp.float32(-1e10), w)
    w = jax.nn.softmax(w, axis=-2)
    o = jnp.einsum("bioh,bodh->bidh", w, vs).reshape(B, Nq, -1)
    return o @ mod.wo.T


if __name__ == "__main__":
    key = jax.random.PRNGKey(0)
    k_param, k_q, k_k, k_v = jax.random.split(key, 4)

    B, Nq, Nk = 2, 8, 8
    d_q_in = d_k_in = d_v_in = 16
    H, d_atn, d_v, d_out = 4, 8, 8, 16

    mod = MultiHeadAttentionPallas(H, d_q_in, d_k_in, d_v_in, d_atn, d_v, d_out, k_param)

    queries = jax.random.normal(k_q, (B, Nq, d_q_in), jnp.float32)
    keys = jax.random.normal(k_k, (B, Nk, d_k_in), jnp.float32)
    values = jax.random.normal(k_v, (B, Nk, d_v_in), jnp.float32)
    # causal-style 0/1 mask (each query row attends to at least one key)
    mask = (jnp.arange(Nk)[None, :] <= jnp.arange(Nq)[:, None]).astype(jnp.int32)
    mask = jnp.broadcast_to(mask, (B, Nq, Nk))

    out = mod(queries, keys, values, mask)
    out = jax.block_until_ready(out)

    ref = reference_forward(mod, queries, keys, values, mask)
    assert out.shape == (B, Nq, d_out), out.shape
    assert jnp.allclose(out, ref, atol=1e-4, rtol=1e-4), float(jnp.max(jnp.abs(out - ref)))

    print("KERNEL_OK")
</pallas_src>

<mosaic_0001>
module attributes {stable_mosaic.version = 11 : i64} {
  func.func @_matmul_kernel(%arg0: i32, %arg1: i32, %arg2: i32, %arg3: memref<16x16xf32, #tpu.memory_space<vmem>>, %arg4: memref<16x32xf32, #tpu.memory_space<vmem>>, %arg5: memref<16x32xf32, #tpu.memory_space<vmem>>, %arg6: memref<16x32xf32, #tpu.memory_space<vmem>>) attributes {dimension_semantics = [#tpu.dimension_semantics<parallel>, #tpu.dimension_semantics<parallel>, #tpu.dimension_semantics<arbitrary>], iteration_bounds = array<i64: 1, 1, 1>, scalar_prefetch = 0 : i64, scratch_operands = 1 : i64, tpu.core_type = #tpu.core_type<tc>, window_params = [{transform_indices = @transform_0, window_bounds = array<i64: 16, 16>}, {transform_indices = @transform_1, window_bounds = array<i64: 16, 32>}, {transform_indices = @transform_2, window_bounds = array<i64: 16, 32>}]} {
    %c0_i32 = arith.constant 0 : i32
    %0 = arith.cmpi eq, %arg2, %c0_i32 : i32
    %1 = arith.extui %0 : i1 to i32
    %c0_i32_0 = arith.constant 0 : i32
    %2 = arith.cmpi ne, %1, %c0_i32_0 : i32
    scf.if %2 {
      %cst_10 = arith.constant 0.000000e+00 : f32
      %12 = vector.broadcast %cst_10 : f32 to vector<16x32xf32>
      %c0_11 = arith.constant 0 : index
      %c0_12 = arith.constant 0 : index
      %13 = vector.load %arg6[%c0_11, %c0_12] : memref<16x32xf32, #tpu.memory_space<vmem>>, vector<16x32xf32>
      tpu.vector_store %arg6[%c0_11, %c0_12], %12 {strides = array<i32>} : memref<16x32xf32, #tpu.memory_space<vmem>>, vector<16x32xf32>,
    } else {
    }
    %c0 = arith.constant 0 : index
    %c0_1 = arith.constant 0 : index
    %3 = vector.load %arg6[%c0, %c0_1] : memref<16x32xf32, #tpu.memory_space<vmem>>, vector<16x32xf32>
    %c0_2 = arith.constant 0 : index
    %c0_3 = arith.constant 0 : index
    %4 = vector.load %arg3[%c0_2, %c0_3] : memref<16x16xf32, #tpu.memory_space<vmem>>, vector<16x16xf32>
    %c0_4 = arith.constant 0 : index
    %c0_5 = arith.constant 0 : index
    %5 = vector.load %arg4[%c0_4, %c0_5] : memref<16x32xf32, #tpu.memory_space<vmem>>, vector<16x32xf32>
    %cst = arith.constant dense<0.000000e+00> : vector<16x32xf32>
    %6 = tpu.matmul %4, %5, %cst {dimension_numbers = #tpu.dot_dimension_numbers<[1], [0], [0], [1], [0, 0, 1, 1], [], []>} : vector<16x16xf32>, vector<16x32xf32>, vector<16x32xf32> -> vector<16x32xf32>
    %7 = arith.addf %3, %6 : vector<16x32xf32>
    %c0_6 = arith.constant 0 : index
    %c0_7 = arith.constant 0 : index
    %8 = vector.load %arg6[%c0_6, %c0_7] : memref<16x32xf32, #tpu.memory_space<vmem>>, vector<16x32xf32>
    tpu.vector_store %arg6[%c0_6, %c0_7], %7 {strides = array<i32>} : memref<16x32xf32, #tpu.memory_space<vmem>>, vector<16x32xf32>,
    %c0_i32_8 = arith.constant 0 : i32
    %9 = arith.cmpi eq, %arg2, %c0_i32_8 : i32
    %10 = arith.extui %9 : i1 to i32
    %c0_i32_9 = arith.constant 0 : i32
    %11 = arith.cmpi ne, %10, %c0_i32_9 : i32
    scf.if %11 {
      %c0_10 = arith.constant 0 : index
      %c0_11 = arith.constant 0 : index
      %12 = vector.load %arg6[%c0_10, %c0_11] : memref<16x32xf32, #tpu.memory_space<vmem>>, vector<16x32xf32>
      %c0_12 = arith.constant 0 : index
      %c0_13 = arith.constant 0 : index
      %13 = vector.load %arg5[%c0_12, %c0_13] : memref<16x32xf32, #tpu.memory_space<vmem>>, vector<16x32xf32>
      tpu.vector_store %arg5[%c0_12, %c0_13], %12 {strides = array<i32>} : memref<16x32xf32, #tpu.memory_space<vmem>>, vector<16x32xf32>,
    } else {
    }
    return
  }
  func.func @transform_0(%arg0: i32, %arg1: i32, %arg2: i32) -> (i32, i32) {
    %c0_i32 = arith.constant 0 : i32
    return %arg0, %arg2 : i32, i32
  }
  func.func @transform_1(%arg0: i32, %arg1: i32, %arg2: i32) -> (i32, i32) {
    %c0_i32 = arith.constant 0 : i32
    return %arg2, %arg1 : i32, i32
  }
  func.func @transform_2(%arg0: i32, %arg1: i32, %arg2: i32) -> (i32, i32) {
    %c0_i32 = arith.constant 0 : i32
    return %arg0, %arg1 : i32, i32
  }
}

</mosaic_0001>

<bundles_post_ra>
// kernel: tpu_custom_call.1
= control target key start
LH: loop header
LB: loop body
LE: loop exit
PB: predicated region body
PF: predicated region fallthrough
CT: control target
= control target key end

     0   :  { %7 = vsyncpa [#allocation4], 0  ;;  %s332_s0 = inlined_call_operand.hbm [shape: f32[16,16], index: 0, kind: input, shape index: {}]   ;;  %s333_s1 = inlined_call_operand.hbm [shape: f32[16,32], index: 1, kind: input, shape index: {}]   ;;  %s334_s2 = inlined_call_operand.hbm [shape: f32[16,32], index: 2, kind: output, shape index: {}]  }
   0x1   :  { %8 = vsyncpa [#allocation7], 0 }
   0x2   :  { %9 = vsyncpa [#allocation5], 0  ;;  %s260_s9 = smov [#allocation3]   ;;  %s188_s13 = scalar_lea.hbm %s332_s0, 256 }
   0x3   :  { %s15_s10 = sshll.u32 %s260_s9, 4  ;;  %p189_p0 = scmp.ne.s32.totalorder %s332_s0, %s188_s13  ;;  %s16_s10 = int_to_ptr.vmem [resolvable:$true] %s15_s10 }
   0x4   :  { %p192_p1 = scmp.lt.u32.totalorder %s188_s13, %s332_s0 }
   0x6   :  { %p194_p2 = pnand %p192_p1, %p189_p0 }
   0x8   :  { %197 = shalt.err (!%p194_p2)
}
   0x9   :  { %s198_s18 = scalar_lea.vmem %s16_s10, 256  ;;  %p203_p4 = scmp.lt.s32.totalorder %s16_s10, %s16_s10 }
   0xa   :  { %p199_p3 = scmp.ne.s32.totalorder %s16_s10, %s198_s18  ;;  %p204_p5 = scmp.lt.s32.totalorder %s198_s18, %s198_s18 }
   0xc   :  { %p205_p6 = por %p204_p5, %p203_p4 }
   0xe   :  { %p206_p7 = pnand %p205_p6, %p199_p3 }
  0x10   :  { %209 = shalt.err (!%p206_p7)
}
  0x11   :  { %s261_s19 = smov 128   ;;  %s262_s20 = smov 8  }
  0x12   :  { %21 = dma.hbm_to_vmem [thread:$0]  %s332_s0, 256, %s16_s10, [#allocation4], %s261_s19, %s261_s19, %s262_s20  }
  0x13   :  { %s263_s23 = smov [#allocation6]   ;;  %s210_s27 = scalar_lea.hbm %s333_s1, 256 }
  0x14   :  { %s27_s24 = sshll.u32 %s263_s23, 4  ;;  %p211_p8 = scmp.ne.s32.totalorder %s333_s1, %s210_s27  ;;  %s28_s24 = int_to_ptr.vmem [resolvable:$true] %s27_s24 }
  0x15   :  { %p214_p9 = scmp.lt.u32.totalorder %s210_s27, %s333_s1 }
  0x17   :  { %p216_p10 = pnand %p214_p9, %p211_p8 }
  0x19   :  { %219 = shalt.err (!%p216_p10)
}
  0x1a   :  { %s220_s4 = scalar_lea.vmem %s28_s24, 256  ;;  %p225_p12 = scmp.lt.s32.totalorder %s28_s24, %s28_s24 }
  0x1b   :  { %p221_p11 = scmp.ne.s32.totalorder %s28_s24, %s220_s4  ;;  %p226_p13 = scmp.lt.s32.totalorder %s220_s4, %s220_s4 }
  0x1d   :  { %p227_p0 = por %p226_p13, %p225_p12 }
  0x1f   :  { %p228_p1 = pnand %p227_p0, %p221_p11 }
  0x21   :  { %231 = shalt.err (!%p228_p1)
}
  0x22   :  { %33 = dma.hbm_to_vmem [thread:$0]  %s333_s1, 256, %s28_s24, [#allocation7], %s261_s19, %s261_s19, %s262_s20  }
  0x23   :  { %254 = dma.done.wait [#allocation4], 256  }
  0x24   :  { %255 = vsyncadd [#allocation4], 4294967040 }
  0x25   :  { %256 = dma.done.wait [#allocation7], 256  }
  0x26   :  { %257 = vsyncadd [#allocation7], 4294967040  ;;  %vm44_vm0 = vcmask 261120   ;;  %v264_v0 = vmov 0.0   ;;  %vm53_vm1 = vcmask 130048   ;;  %v51_v1 = vld [vmem:[#allocation6] sm:$0xff] }
  0x27   :  { %46 = vst.msk [vmem:[#allocation2 + $0x8] sm:$0xff] %vm44_vm0, %v264_v0  ;;  %45 = vst.msk [vmem:[#allocation2] sm:$0xff] %vm44_vm0, %v264_v0  ;;  %v52_v2 = vld [vmem:[#allocation6 + $0x8] sm:$0xff]  ;;  %v49_v3 = vld [vmem:[#allocation3] sm:$0xff]  ;;  %s265_s1 = smov [#allocation8]  }
  0x28   :  { %v178_v4 = vpack.c.bf16 %v52_v2, %v51_v1  ;;  %175 = vmatprep.mubr.msk.f32.mxu0 %vm53_vm1, %v49_v3  ;;  %v50_v5 = vld [vmem:[#allocation3 + $0x8] sm:$0xff]  ;;  %s152_s6 = sshll.u32 %s265_s1, 4  ;;  %s153_s6 = int_to_ptr.vmem [resolvable:$true] %s152_s6 }
  0x29   :  { %s232_s7 = scalar_lea.vmem %s153_s6, 256  ;;  %p237_p3 = scmp.lt.s32.totalorder %s153_s6, %s153_s6 }
  0x2a   :  { %179 = vmatprep.subr.bf16.mxu0 %v178_v4  ;;  %p233_p2 = scmp.ne.s32.totalorder %s153_s6, %s232_s7  ;;  %p238_p4 = scmp.lt.s32.totalorder %s232_s7, %s232_s7 }
  0x2b   :  { %181 = vmatpush3.bf16.msra.mxu0 %v178_v4 }
  0x2c   :  { %p239_p5 = por %p238_p4, %p237_p3 }
  0x2e   :  { %176 = vmatmul.mubr.msk.f32.vlgmr.msra.gmra.mrb[0].mxu0 %vm53_vm1, %v50_v5  ;;  %v48_v6 = vld [vmem:[#allocation2 + $0x8] sm:$0xff]  ;;  %v47_v7 = vld [vmem:[#allocation2] sm:$0xff]  ;;  %p240_p6 = pnand %p239_p5, %p233_p2 }
 0x101   :  { %v177_v8 = vpop.f32.mrb[0].mxu0 }
 0x102   :  { %v136_v9 = vadd.f32 %v177_v8, %v48_v6  ;;  %v126_v10 = vpop.f32.mrb[1].mxu0 }
 0x103   :  { %v135_v11 = vadd.f32 %v126_v10, %v47_v7 }
 0x104   :  { %139 = vst.msk [vmem:[#allocation2 + $0x8] sm:$0xff] %vm44_vm0, %v136_v9 }
 0x105   :  { %138 = vst.msk [vmem:[#allocation2] sm:$0xff] %vm44_vm0, %v135_v11 }
 0x10b   :  { %v144_v12 = vld [vmem:[#allocation2 + $0x8] sm:$0xff] }
 0x10c   :  { %v143_v13 = vld [vmem:[#allocation2] sm:$0xff]  ;;  %146 = vst.msk [vmem:[#allocation8 + $0x8] sm:$0xff] %vm44_vm0, %v144_v12 }
 0x10d   :  { %145 = vst.msk [vmem:[#allocation8] sm:$0xff] %vm44_vm0, %v143_v13 }
 0x10e   :  { %243 = shalt.err (!%p240_p6)
}
 0x10f   :  { %s244_s10 = scalar_lea.hbm %s334_s2, 256 }
 0x110   :  { %p245_p7 = scmp.ne.s32.totalorder %s334_s2, %s244_s10  ;;  %p248_p8 = scmp.lt.u32.totalorder %s244_s10, %s334_s2 }
 0x112   :  { %p250_p9 = pnand %p248_p8, %p245_p7 }
 0x114   :  { %253 = shalt.err (!%p250_p9)
}
 0x115   :  { %158 = dma.vmem_to_hbm [thread:$0]  %s153_s6, 256, %s334_s2, [#allocation5], %s261_s19, %s261_s19, %s262_s20  }
 0x116   :  { %258 = dma.done.wait [#allocation5], 256  }
 0x117   :  { %259 = vsyncadd [#allocation5], 4294967040 }
 0x118   :  { %162 = vsyncpa [#allocation4], 1 }
 0x119   :  { %163 = vsyncpa [#allocation7], 1 }
 0x11a   :  { %164 = vsyncpa [#allocation5], 1 }

</bundles_post_ra>
